<compile_context>
chip_gen: v5e
topology: v5e:2x2
jax: 0.10.0
libtpu: 0.0.40
codegen_flags: <defaults>
</compile_context>

<pallas_src>
import functools

import jax
import jax.numpy as jnp
from jax.experimental import pallas as pl
from jax.experimental.pallas import tpu as pltpu

_LANE = 128
_NEG_BIG = -1e30  # finite "minus infinity" so masked lanes never produce NaN


def _round_up(x, m):
    return -(-x // m) * m


# -----------------------------------------------------------------------------
# Kernels
# -----------------------------------------------------------------------------
def _ls_ce_single_kernel(preds_ref, target_ref, out_ref, *, epsilon, c_total):
    """Whole class axis in one block: direct LSE, no scratch, no pl.when."""
    x = preds_ref[...].astype(jnp.float32)                  # (tile_n, C)
    t = target_ref[...].astype(jnp.int32)                   # (tile_n, 1)

    m = jnp.max(x, axis=-1, keepdims=True)
    s = jnp.sum(jnp.exp(x - m), axis=-1, keepdims=True)
    lse = m + jnp.log(s)

    cols = jax.lax.broadcasted_iota(jnp.int32, x.shape, 1)
    xt = jnp.sum(jnp.where(cols == t, x, 0.0), axis=-1, keepdims=True)
    sx = jnp.sum(x, axis=-1, keepdims=True)

    eps = jnp.float32(epsilon)
    # Closed form of -sum(q * log_softmax(x)) for q = eps/(C-1) off-target,
    # (1-eps) on the target class (matches the PyTorch module's scatter_).
    out_ref[...] = ((1.0 - eps) * (lse - xt) + eps * lse
                    - (eps / jnp.float32(c_total - 1)) * (sx - xt))


def _ls_ce_online_kernel(preds_ref, target_ref, out_ref,
                         m_ref, s_ref, sx_ref, xt_ref,
                         *, epsilon, c_total, tile_c, tail_valid):
    """Grid = (row blocks [parallel], class blocks [arbitrary]); online LSE."""
    k = pl.program_id(1)
    last_k = pl.num_programs(1) - 1

    @pl.when(k == 0)
    def _():
        m_ref[...] = jnp.full_like(m_ref, _NEG_BIG)
        s_ref[...] = jnp.zeros_like(s_ref)
        sx_ref[...] = jnp.zeros_like(sx_ref)
        xt_ref[...] = jnp.zeros_like(xt_ref)

    x = preds_ref[...].astype(jnp.float32)                   # (tile_n, tile_c)
    t_local = target_ref[...].astype(jnp.int32) - k * tile_c  # (tile_n, 1)
    local = jax.lax.broadcasted_iota(jnp.int32, x.shape, 1)   # block-local cols

    def update(x_lse, sx_blk):
        m_new = jnp.maximum(m_ref[...], jnp.max(x_lse, axis=-1, keepdims=True))
        s_ref[...] = (s_ref[...] * jnp.exp(m_ref[...] - m_new)
                      + jnp.sum(jnp.exp(x_lse - m_new), axis=-1, keepdims=True))
        m_ref[...] = m_new
        sx_ref[...] = sx_ref[...] + sx_blk
        xt_ref[...] = xt_ref[...] + jnp.sum(
            jnp.where(local == t_local, x, 0.0), axis=-1, keepdims=True)

    if tail_valid == tile_c:
        # C is a multiple of tile_c: no column masking anywhere (static).
        update(x, jnp.sum(x, axis=-1, keepdims=True))
    else:
        @pl.when(k != last_k)
        def _():
            # Interior class blocks: fully valid -> no masking work.
            update(x, jnp.sum(x, axis=-1, keepdims=True))

        @pl.when(k == last_k)
        def _():
            # Only the last class block carries padded tail columns.
            col_ok = local < tail_valid
            update(jnp.where(col_ok, x, jnp.float32(_NEG_BIG)),
                   jnp.sum(jnp.where(col_ok, x, 0.0), axis=-1, keepdims=True))

    @pl.when(k == last_k)
    def _():
        eps = jnp.float32(epsilon)
        lse = m_ref[...] + jnp.log(s_ref[...])
        xt = xt_ref[...]
        out_ref[...] = ((1.0 - eps) * (lse - xt) + eps * lse
                        - (eps / jnp.float32(c_total - 1)) * (sx_ref[...] - xt))


# -----------------------------------------------------------------------------
# Tiling / chip configuration
# -----------------------------------------------------------------------------
def _tpu_vmem_bytes():
    try:
        info = pltpu.get_tpu_info()
        v = getattr(info, "vmem_capacity_bytes", None)
        if v:
            return int(v)
    except Exception:
        pass
    return 64 << 20  # conservative fallback (v7x-like)


def _choose_config(n, c, itemsize):
    """Returns (tile_n, tile_c, vmem_limit_bytes), gated on the chip generation."""
    vmem = _tpu_vmem_bytes()
    small_vmem = vmem <= (96 << 20)          # v7x (64 MiB/TC) or unknown
    budget = (16 << 20) if small_vmem else (32 << 20)   # 2x preds input buffers
    vmem_limit = (44 << 20) if small_vmem else (64 << 20)

    row_align = 16 if itemsize == 2 else 8   # bf16 sublane packing vs f32
    n_pad = _round_up(n, row_align)
    c_lanes = _round_up(c, _LANE)            # lane padding counts toward VMEM

    if 2 * row_align * c_lanes * itemsize <= budget:
        tile_c = c                           # whole class axis in one block
        c_bytes = c_lanes
    else:
        tile_c = 2048                        # lane-aligned chunk; online LSE handles rest
        c_bytes = 2048

    max_rows = budget // (2 * c_bytes * itemsize)
    tile_n = max(row_align, min(1024, (max_rows // row_align) * row_align))

    if small_vmem and n_pad >= 2 * row_align:
        # 2-TensorCore part: keep >=2 row blocks so both cores get work.
        tile_n = min(tile_n, _round_up(pl.cdiv(n_pad, 2), row_align))

    return min(tile_n, n_pad), tile_c, vmem_limit


# -----------------------------------------------------------------------------
# Wrapper
# -----------------------------------------------------------------------------
def label_smoothing_cross_entropy(preds, target, epsilon: float = 0.1,
                                  tile_n=None, tile_c=None):
    """preds: (..., C) float logits, target: (...) int class ids -> scalar loss."""
    c = preds.shape[-1]
    if c < 2:
        raise ValueError("label smoothing needs at least 2 classes (C >= 2)")
    preds2d = preds.reshape(-1, c)
    n = preds2d.shape[0]
    target2d = target.reshape(-1).astype(jnp.int32).reshape(n, 1)

    itemsize = jnp.dtype(preds.dtype).itemsize
    row_align = 16 if itemsize == 2 else 8
    auto_n, auto_c, vmem_limit = _choose_config(n, c, itemsize)

    tile_n = auto_n if tile_n is None else max(row_align, _round_up(tile_n, row_align))
    tile_c = auto_c if tile_c is None else tile_c
    tile_c = min(tile_c, c)
    if tile_c < c:
        # Validate user-supplied class tiles against the lane constraint.
        tile_c = max(_LANE, _round_up(tile_c, _LANE))
        if tile_c >= c:
            tile_c = c
    n_pad = _round_up(n, row_align)
    tile_n = min(tile_n, n_pad)

    n_blocks = pl.cdiv(n, tile_n)
    c_blocks = pl.cdiv(c, tile_c)
    out_rows = n_blocks * tile_n

    compiler_params_1d = pltpu.CompilerParams(
        dimension_semantics=("parallel",), vmem_limit_bytes=vmem_limit)
    compiler_params_2d = pltpu.CompilerParams(
        dimension_semantics=("parallel", "arbitrary"), vmem_limit_bytes=vmem_limit)

    if c_blocks == 1:
        kernel = functools.partial(_ls_ce_single_kernel,
                                   epsilon=float(epsilon), c_total=c)
        per_row = pl.pallas_call(
            kernel,
            out_shape=jax.ShapeDtypeStruct((out_rows, 1), jnp.float32),
            grid_spec=pltpu.PrefetchScalarGridSpec(
                num_scalar_prefetch=0,
                grid=(n_blocks,),
                in_specs=[pl.BlockSpec((tile_n, c), lambda i: (i, 0)),
                          pl.BlockSpec((tile_n, 1), lambda i: (i, 0))],
                out_specs=pl.BlockSpec((tile_n, 1), lambda i: (i, 0)),
            ),
            compiler_params=compiler_params_1d,
        )(preds2d, target2d)
    else:
        tail_valid = c - (c_blocks - 1) * tile_c   # valid cols in the last block
        kernel = functools.partial(_ls_ce_online_kernel,
                                   epsilon=float(epsilon), c_total=c,
                                   tile_c=tile_c, tail_valid=tail_valid)
        per_row = pl.pallas_call(
            kernel,
            out_shape=jax.ShapeDtypeStruct((out_rows, 1), jnp.float32),
            grid_spec=pltpu.PrefetchScalarGridSpec(
                num_scalar_prefetch=0,
                grid=(n_blocks, c_blocks),
                in_specs=[pl.BlockSpec((tile_n, tile_c), lambda i, k: (i, k)),
                          pl.BlockSpec((tile_n, 1), lambda i, k: (i, 0))],
                out_specs=pl.BlockSpec((tile_n, 1), lambda i, k: (i, 0)),
                scratch_shapes=[pltpu.VMEM((tile_n, 1), jnp.float32)] * 4,
            ),
            compiler_params=compiler_params_2d,
        )(preds2d, target2d)

    # Tail-row masking + mean in plain JAX (per-row output rows beyond n are
    # padded garbage and simply sliced away).
    return jnp.sum(per_row[:n, 0]) / jnp.float32(n)


# -----------------------------------------------------------------------------
# Reference + tests
# -----------------------------------------------------------------------------
def _reference(preds, target, epsilon=0.1):
    log_prob = jax.nn.log_softmax(preds.astype(jnp.float32), axis=-1)
    c = preds.shape[-1]
    q = jnp.full_like(log_prob, epsilon / (c - 1.0))
    one_hot = jax.nn.one_hot(target, c, dtype=log_prob.dtype)
    q = q * (1.0 - one_hot) + one_hot * (1.0 - epsilon)
    return (-q * log_prob).sum(axis=-1).mean()


if __name__ == "__main__":
    key = jax.random.PRNGKey(0)
    k1, k2, k3, k4, k5, k6 = jax.random.split(key, 6)

    # Case 1: multi-dim leading shape, auto tiles -> specialized single
    # class-block kernel (the common configuration).
    B, T, C = 2, 4, 32
    preds = jax.random.normal(k1, (B, T, C), dtype=jnp.float32)
    target = jax.random.randint(k2, (B, T), 0, C, dtype=jnp.int32)
    loss = jax.block_until_ready(label_smoothing_cross_entropy(preds, target, 0.1))
    ref = _reference(preds, target, 0.1)
    assert jnp.allclose(loss, ref, atol=1e-5, rtol=1e-5), (loss, ref)

    # Case 2: non-divisible N and C with forced small tiles -> multi-block
    # online-LSE kernel with class-tail masking (last block only) and row tail.
    N2, C2 = 13, 160
    preds2 = jax.random.normal(k3, (N2, C2), dtype=jnp.float32)
    target2 = jax.random.randint(k4, (N2,), 0, C2, dtype=jnp.int32)
    loss2 = jax.block_until_ready(
        label_smoothing_cross_entropy(preds2, target2, 0.1, tile_n=8, tile_c=128))
    ref2 = _reference(preds2, target2, 0.1)
    assert jnp.allclose(loss2, ref2, atol=1e-4, rtol=1e-5), (loss2, ref2)

    # Case 3: bf16 logits (halves HBM bytes on mem-bound parts; kernel upcasts
    # in VMEM) exercising the 16-row sublane alignment path.
    N3, C3 = 16, 96
    preds3 = jax.random.normal(k5, (N3, C3), dtype=jnp.float32).astype(jnp.bfloat16)
    target3 = jax.random.randint(k6, (N3,), 0, C3, dtype=jnp.int32)
    loss3 = jax.block_until_ready(label_smoothing_cross_entropy(preds3, target3, 0.1))
    ref3 = _reference(preds3, target3, 0.1)
    assert jnp.allclose(loss3, ref3, atol=1e-4, rtol=1e-4), (loss3, ref3)

    print("KERNEL_OK")
</pallas_src>

<mosaic_0001>
module attributes {stable_mosaic.version = 11 : i64} {
  func.func @_ls_ce_single_kernel(%arg0: i32, %arg1: memref<8x32xf32, #tpu.memory_space<vmem>>, %arg2: memref<8x1xi32, #tpu.memory_space<vmem>>, %arg3: memref<8x1xf32, #tpu.memory_space<vmem>>) attributes {dimension_semantics = [#tpu.dimension_semantics<parallel>], iteration_bounds = array<i64: 1>, scalar_prefetch = 0 : i64, scratch_operands = 0 : i64, tpu.core_type = #tpu.core_type<tc>, window_params = [{transform_indices = @transform_0, window_bounds = array<i64: 8, 32>}, {transform_indices = @transform_1, window_bounds = array<i64: 8, 1>}, {transform_indices = @transform_2, window_bounds = array<i64: 8, 1>}]} {
    %c0 = arith.constant 0 : index
    %c0_0 = arith.constant 0 : index
    %0 = vector.load %arg1[%c0, %c0_0] : memref<8x32xf32, #tpu.memory_space<vmem>>, vector<8x32xf32>
    %c0_1 = arith.constant 0 : index
    %c0_2 = arith.constant 0 : index
    %1 = vector.load %arg2[%c0_1, %c0_2] : memref<8x1xi32, #tpu.memory_space<vmem>>, vector<8x1xi32>
    %cst = arith.constant dense<0xFF800000> : vector<8xf32>
    %2 = vector.multi_reduction <maximumf>, %0, %cst [1] : vector<8x32xf32> to vector<8xf32>
    %3 = vector.shape_cast %2 : vector<8xf32> to vector<8x1xf32>
    %4 = vector.broadcast %3 : vector<8x1xf32> to vector<8x32xf32>
    %5 = arith.subf %0, %4 : vector<8x32xf32>
    %6 = math.exp %5 : vector<8x32xf32>
    %cst_3 = arith.constant dense<0.000000e+00> : vector<8xf32>
    %7 = vector.multi_reduction <add>, %6, %cst_3 [1] : vector<8x32xf32> to vector<8xf32>
    %8 = vector.shape_cast %7 : vector<8xf32> to vector<8x1xf32>
    %9 = math.log %8 : vector<8x1xf32>
    %10 = arith.addf %3, %9 : vector<8x1xf32>
    %11 = tpu.iota {dimensions = array<i32: 1>} : vector<8x32xi32>
    %12 = vector.broadcast %1 : vector<8x1xi32> to vector<8x32xi32>
    %13 = arith.cmpi eq, %11, %12 : vector<8x32xi32>
    %cst_4 = arith.constant 0.000000e+00 : f32
    %14 = vector.broadcast %cst_4 : f32 to vector<8x32xf32>
    %15 = arith.select %13, %0, %14 : vector<8x32xi1>, vector<8x32xf32>
    %cst_5 = arith.constant dense<0.000000e+00> : vector<8xf32>
    %16 = vector.multi_reduction <add>, %15, %cst_5 [1] : vector<8x32xf32> to vector<8xf32>
    %17 = vector.shape_cast %16 : vector<8xf32> to vector<8x1xf32>
    %cst_6 = arith.constant dense<0.000000e+00> : vector<8xf32>
    %18 = vector.multi_reduction <add>, %0, %cst_6 [1] : vector<8x32xf32> to vector<8xf32>
    %19 = vector.shape_cast %18 : vector<8xf32> to vector<8x1xf32>
    %cst_7 = arith.constant 1.000000e+00 : f32
    %cst_8 = arith.constant 1.000000e-01 : f32
    %20 = arith.subf %cst_7, %cst_8 : f32
    %21 = arith.subf %10, %17 : vector<8x1xf32>
    %22 = vector.broadcast %20 : f32 to vector<8x1xf32>
    %23 = arith.mulf %22, %21 : vector<8x1xf32>
    %cst_9 = arith.constant 1.000000e-01 : f32
    %24 = vector.broadcast %cst_9 : f32 to vector<8x1xf32>
    %25 = arith.mulf %24, %10 : vector<8x1xf32>
    %26 = arith.addf %23, %25 : vector<8x1xf32>
    %cst_10 = arith.constant 1.000000e-01 : f32
    %cst_11 = arith.constant 3.100000e+01 : f32
    %27 = arith.divf %cst_10, %cst_11 : f32
    %28 = arith.subf %19, %17 : vector<8x1xf32>
    %29 = vector.broadcast %27 : f32 to vector<8x1xf32>
    %30 = arith.mulf %29, %28 : vector<8x1xf32>
    %31 = arith.subf %26, %30 : vector<8x1xf32>
    %c0_12 = arith.constant 0 : index
    %c0_13 = arith.constant 0 : index
    %32 = vector.load %arg3[%c0_12, %c0_13] : memref<8x1xf32, #tpu.memory_space<vmem>>, vector<8x1xf32>
    tpu.vector_store %arg3[%c0_12, %c0_13], %31 {strides = array<i32>} : memref<8x1xf32, #tpu.memory_space<vmem>>, vector<8x1xf32>,
    return
  }
  func.func @transform_0(%arg0: i32) -> (i32, i32) {
    %c0_i32 = arith.constant 0 : i32
    %c0_i32_0 = arith.constant 0 : i32
    return %arg0, %c0_i32 : i32, i32
  }
  func.func @transform_1(%arg0: i32) -> (i32, i32) {
    %c0_i32 = arith.constant 0 : i32
    %c0_i32_0 = arith.constant 0 : i32
    return %arg0, %c0_i32 : i32, i32
  }
  func.func @transform_2(%arg0: i32) -> (i32, i32) {
    %c0_i32 = arith.constant 0 : i32
    %c0_i32_0 = arith.constant 0 : i32
    return %arg0, %c0_i32 : i32, i32
  }
}

</mosaic_0001>

<bundles_post_ra>
// kernel: tpu_custom_call.1
= control target key start
LH: loop header
LB: loop body
LE: loop exit
PB: predicated region body
PF: predicated region fallthrough
CT: control target
= control target key end

     0   :  { %vm13_vm0 = vcmask 261120   ;;  %v58_v1 = vmov 0   ;;  %v26_v10 = vlaneseq  ;;  %vm46_vm2 = vcmask 7168   ;;  %s87_s0 = inlined_call_operand.vmem [shape: f32[8,32], index: 0, kind: input, shape index: {}]   ;;  %s88_s1 = inlined_call_operand.vmem [shape: s32[8,1], index: 1, kind: input, shape index: {}]   ;;  %s89_s2 = inlined_call_operand.vmem [shape: f32[8,1], index: 2, kind: output, shape index: {}]  }
   0x1   :  { %v11_v0 = vld [vmem:[%s87_s0] sm:$0xff]  ;;  %53 = vset.pattern.permute.xlu0 %v58_v1 }
   0x2   :  { %v14_v2 = vsel %vm13_vm0, %v11_v0, -inf  ;;  %v12_v3 = vld [vmem:[%s88_s1] sm:$0xff]  ;;  %v36_v4 = vsel %vm13_vm0, %v11_v0, 0.0  ;;  %v27_v11 = vand.u32 127, %v26_v10 }
   0x3   :  { %15 = vmax.xlane.f32.xlu0 %v14_v2  ;;  %37 = vadd.xlane.f32.xlu2 %v36_v4 }
  0x17   :  { %29 = vperm.xlu0 %53, %v12_v3  }
  0x76   :  { %v16_v5 = vpop.xlane.xlu0 %15  ;;  %v38_v18 = vpop.xlane.xlu2 %37 }
  0x77   :  { %v17_v6 = vsub.f32 %v11_v0, %v16_v5 }
  0x79   :  { %v18_v7 = vmul.f32 1.442695, %v17_v6 }
  0x7b   :  { %54 = vpow2.f32 %v18_v7 }
  0x81   :  { %v55_v8 = vpop.eup %54 }
  0x82   :  { %v20_v9 = vsel %vm13_vm0, %v55_v8, 0.0 }
  0x83   :  { %21 = vadd.xlane.f32.xlu1 %v20_v9 }
  0x89   :  { %v30_v12 = vpop.permute.xlu0 %29 }
  0x8a   :  { %vm31_vm1 = vcmp.eq.s32.totalorder %v27_v11, %v30_v12 }
  0x8b   :  { %v32_v13 = vsel %vm31_vm1, %v11_v0, 0.0 }
  0x8c   :  { %v33_v14 = vsel %vm13_vm0, %v32_v13, 0.0 }
  0x8d   :  { %34 = vadd.xlane.f32.xlu1 %v33_v14 }
  0xf6   :  { %v22_v15 = vpop.xlane.xlu1 %21 }
  0xf7   :  { %56 = vlog2.f32 %v22_v15 }
  0xfd   :  { %v57_v16 = vpop.eup %56 }
  0xfe   :  { %v24_v17 = vmul.f32 0.6931472, %v57_v16 }
 0x100   :  { %v25_v19 = vadd.f32 %v24_v17, %v16_v5  ;;  %v35_v20 = vpop.xlane.xlu1 %34 }
 0x101   :  { %v43_v22 = vsub.f32 %v38_v18, %v35_v20 }
 0x102   :  { %v39_v21 = vsub.f32 %v25_v19, %v35_v20  ;;  %v41_v23 = vmul.f32 0.1, %v25_v19 }
 0x103   :  { %v44_v26 = vmul.f32 0.0032258064, %v43_v22 }
 0x104   :  { %v40_v24 = vmul.f32 0.9, %v39_v21 }
 0x106   :  { %v42_v25 = vadd.f32 %v41_v23, %v40_v24 }
 0x108   :  { %v45_v27 = vsub.f32 %v42_v25, %v44_v26 }
 0x10a   :  { %47 = vst.msk [vmem:[%s89_s2] sm:$0xff] %vm46_vm2, %v45_v27 }

</bundles_post_ra>
